<compile_context>
chip_gen: v6e
topology: v6e:2x2x1
jax: 0.10.0
libtpu: 0.0.40
codegen_flags: <defaults>
</compile_context>

<pallas_src>
import numpy as np
import jax
import jax.numpy as jnp
from jax.experimental import pallas as pl
from jax.experimental.pallas import tpu as pltpu

NUM_LAYERS = 3  # of the original module; only layer 0 affects the module's output.


def _round_up(x, m):
    return (x + m - 1) // m * m


def _lstm_head_kernel(xw_ref, whh_ref, wlin_ref, blin_ref, out_ref):
    """Layer-0 LSTM recurrence + Linear head for one batch tile.

    xw_ref:   (T, TB, 4H)  pre-projected gates x@W_ih^T + (b_ih+b_hh), g-cols pre-scaled by 2
    whh_ref:  (H, 4H)      W_hh^T (torch gate order i, f, g, o; g-cols pre-scaled by 2)
    wlin_ref: (1, H), blin_ref: (1, 1)   Linear head
    out_ref:  (TB, 1)      Linear(h_final_layer0)
    """
    T, TB, _ = xw_ref.shape
    H = whh_ref.shape[0]
    whh = whh_ref[...]

    def step(xw_t, h, c):
        gates = xw_t + jnp.dot(h, whh, preferred_element_type=jnp.float32)
        sig = jax.nn.sigmoid(gates)              # ONE full-width (TB, 4H) EUP call / step
        i_g = sig[:, 0:H]
        f_g = sig[:, H:2 * H]
        g_g = 2.0 * sig[:, 2 * H:3 * H] - 1.0    # tanh(z) = 2*sigmoid(2z) - 1 (2x in weights)
        o_g = sig[:, 3 * H:4 * H]
        c = f_g * c + i_g * g_g
        h = o_g * jnp.tanh(c)
        return h, c

    h = jnp.zeros((TB, H), jnp.float32)
    c = jnp.zeros((TB, H), jnp.float32)

    if T <= 32:
        for t in range(T):                        # static unroll; h/c stay in vregs
            h, c = step(xw_ref[t], h, c)
    else:
        def body(t, carry):
            return step(xw_ref[t], carry[0], carry[1])
        h, c = jax.lax.fori_loop(0, T, body, (h, c))

    # Head: VPU multiply + lane reduction (avoids an N=1 MXU push).
    out_ref[...] = (jnp.sum(h * wlin_ref[...], axis=1, keepdims=True) + blin_ref[...])


def prepare_params(params):
    """One-time weight prep: transposes, bias fusion, and 2x scaling of the g-gate
    columns so the kernel can use a single full-width sigmoid for all four gates."""
    H = params["w_hh"][0].shape[1]
    gscale = jnp.concatenate(
        [jnp.ones((2 * H,)), jnp.full((H,), 2.0), jnp.ones((H,))]).astype(jnp.float32)
    wih0 = jnp.transpose(params["w_ih"][0]).astype(jnp.float32) * gscale   # (F, 4H)
    whh0 = jnp.transpose(params["w_hh"][0]).astype(jnp.float32) * gscale   # (H, 4H)
    b0 = ((params["b_ih"][0] + params["b_hh"][0]).astype(jnp.float32) * gscale
          ).reshape(1, 4 * H)
    return {
        "wih0": wih0,
        "whh0": whh0,
        "b0": b0,
        "wlin": params["w_lin"].astype(jnp.float32),        # (1, H)
        "blin": params["b_lin"].reshape(1, 1).astype(jnp.float32),
    }


def _choose_tiling(B, T, H):
    """Generation-aware, padding-minimizing batch tiling with a v7x VMEM cap."""
    try:
        kind = jax.devices()[0].device_kind.lower()
    except Exception:  # pragma: no cover
        kind = ""
    # v5e (and older) MXU is 128-wide; v6e/v7x are 256-wide -> bigger rows-per-step fill.
    max_tile = 128 if any(v in kind for v in ("v2", "v3", "v4", "v5")) else 256
    # Keep the double-buffered per-tile gate slab (T*TILE_B*4H f32, 2 buffers) <= ~24 MiB
    # so the pipeline stays double-buffered within v7x's 64 MiB VMEM.
    bytes_per_row = T * 4 * H * 4
    cap = max(8, (24 * 1024 * 1024 // (2 * bytes_per_row)) // 8 * 8)
    max_tile = min(max_tile, cap)
    num_tiles = max(1, -(-B // max_tile))
    tile_b = _round_up(-(-B // num_tiles), 8)   # minimize dead padded rows
    return tile_b, num_tiles


def shallow_regression_lstm(x, prep):
    """x: (B, T, F) float32 (batch_first, like the PyTorch module). Returns (B,)."""
    B, T, F = x.shape
    H = prep["whh0"].shape[0]

    TILE_B, num_tiles = _choose_tiling(B, T, H)
    B_pad = TILE_B * num_tiles

    # Pad batch, then pre-project in XLA so the kernel's DMA slab is lane-dense (4H wide).
    xp = jnp.zeros((B_pad, T, F), jnp.float32).at[:B].set(x.astype(jnp.float32))
    xw = jnp.einsum("btf,fg->btg", xp, prep["wih0"],
                    preferred_element_type=jnp.float32) + prep["b0"]      # (B_pad, T, 4H)
    x_tiles = (xw.reshape(num_tiles, TILE_B, T, 4 * H)
                 .transpose(0, 2, 1, 3))                                   # (nt, T, TB, 4H)

    out = pl.pallas_call(
        _lstm_head_kernel,
        out_shape=jax.ShapeDtypeStruct((B_pad, 1), jnp.float32),
        grid=(num_tiles,),
        in_specs=[
            pl.BlockSpec((None, T, TILE_B, 4 * H), lambda i: (i, 0, 0, 0)),  # gate slab
            pl.BlockSpec((H, 4 * H), lambda i: (0, 0)),   # weights: constant index_map ->
            pl.BlockSpec((1, H), lambda i: (0, 0)),       # VMEM-resident across tiles
            pl.BlockSpec((1, 1), lambda i: (0, 0)),
        ],
        out_specs=pl.BlockSpec((TILE_B, 1), lambda i: (i, 0)),
        compiler_params=pltpu.CompilerParams(
            dimension_semantics=("parallel",),
            vmem_limit_bytes=32 * 1024 * 1024),
    )(x_tiles, prep["whh0"], prep["wlin"], prep["blin"])

    return out[:B, 0]  # matches .flatten() of the (B, 1) Linear output


def init_params(key, num_features, hidden_units):
    """Deterministic init mirroring nn.LSTM / nn.Linear parameter shapes (all 3 layers)."""
    H = hidden_units
    k = 1.0 / np.sqrt(H)
    keys = jax.random.split(key, 4 * NUM_LAYERS + 2)
    w_ih, w_hh, b_ih, b_hh = [], [], [], []
    idx = 0
    for l in range(NUM_LAYERS):
        in_l = num_features if l == 0 else H
        w_ih.append(jax.random.uniform(keys[idx], (4 * H, in_l), jnp.float32, -k, k)); idx += 1
        w_hh.append(jax.random.uniform(keys[idx], (4 * H, H), jnp.float32, -k, k)); idx += 1
        b_ih.append(jax.random.uniform(keys[idx], (4 * H,), jnp.float32, -k, k)); idx += 1
        b_hh.append(jax.random.uniform(keys[idx], (4 * H,), jnp.float32, -k, k)); idx += 1
    w_lin = jax.random.uniform(keys[idx], (1, H), jnp.float32, -k, k); idx += 1
    b_lin = jax.random.uniform(keys[idx], (1,), jnp.float32, -k, k)
    return {"w_ih": w_ih, "w_hh": w_hh, "b_ih": b_ih, "b_hh": b_hh,
            "w_lin": w_lin, "b_lin": b_lin}


def reference_forward(x, params):
    """Pure-JAX reference of the full PyTorch forward (all 3 layers, head on hn[0])."""
    B, T, _ = x.shape
    H = params["w_hh"][0].shape[1]
    layer_in = x.astype(jnp.float32)
    hn = []
    for l in range(NUM_LAYERS):
        h = jnp.zeros((B, H), jnp.float32)
        c = jnp.zeros((B, H), jnp.float32)
        b = params["b_ih"][l] + params["b_hh"][l]
        outs = []
        for t in range(T):
            gates = layer_in[:, t, :] @ params["w_ih"][l].T + h @ params["w_hh"][l].T + b
            i = jax.nn.sigmoid(gates[:, :H]); f = jax.nn.sigmoid(gates[:, H:2 * H])
            g = jnp.tanh(gates[:, 2 * H:3 * H]); o = jax.nn.sigmoid(gates[:, 3 * H:])
            c = f * c + i * g
            h = o * jnp.tanh(c)
            outs.append(h)
        layer_in = jnp.stack(outs, axis=1)
        hn.append(h)
    return (hn[0] @ params["w_lin"].T + params["b_lin"]).reshape(-1)


if __name__ == "__main__":
    B, T, F, H = 2, 8, 4, 32  # batch, seq, num_features, hidden_units
    key = jax.random.PRNGKey(0)
    kx, kp = jax.random.split(key)
    x = jax.random.normal(kx, (B, T, F), dtype=jnp.float32)
    params = init_params(kp, num_features=F, hidden_units=H)
    prep = prepare_params(params)  # one-time transposes / bias fusion / g-gate 2x scaling

    fwd = jax.jit(shallow_regression_lstm)
    out = jax.block_until_ready(fwd(x, prep))

    ref = reference_forward(x, params)
    np.testing.assert_allclose(np.asarray(out), np.asarray(ref), rtol=1e-4, atol=1e-4)

    print("KERNEL_OK")
</pallas_src>

<mosaic_0001>
module attributes {stable_mosaic.version = 11 : i64} {
  func.func @_lstm_head_kernel(%arg0: i32, %arg1: memref<1x8x8x128xf32, #tpu.memory_space<vmem>>, %arg2: memref<32x128xf32, #tpu.memory_space<vmem>>, %arg3: memref<1x32xf32, #tpu.memory_space<vmem>>, %arg4: memref<1x1xf32, #tpu.memory_space<vmem>>, %arg5: memref<8x1xf32, #tpu.memory_space<vmem>>) attributes {dimension_semantics = [#tpu.dimension_semantics<parallel>], iteration_bounds = array<i64: 1>, scalar_prefetch = 0 : i64, scratch_operands = 0 : i64, tpu.core_type = #tpu.core_type<tc>, window_params = [{transform_indices = @transform_0, window_bounds = array<i64: 1, 8, 8, 128>}, {pipeline_mode = #tpu.pipeline_mode<synchronous>, transform_indices = @transform_1, window_bounds = array<i64: 32, 128>}, {pipeline_mode = #tpu.pipeline_mode<synchronous>, transform_indices = @transform_2, window_bounds = array<i64: 1, 32>}, {pipeline_mode = #tpu.pipeline_mode<synchronous>, transform_indices = @transform_3, window_bounds = array<i64: 1, 1>}, {transform_indices = @transform_4, window_bounds = array<i64: 8, 1>}]} {
    %c0 = arith.constant 0 : index
    %c0_0 = arith.constant 0 : index
    %0 = vector.load %arg2[%c0, %c0_0] : memref<32x128xf32, #tpu.memory_space<vmem>>, vector<32x128xf32>
    %cst = arith.constant 0.000000e+00 : f32
    %1 = vector.broadcast %cst : f32 to vector<8x32xf32>
    %cst_1 = arith.constant 0.000000e+00 : f32
    %2 = vector.broadcast %cst_1 : f32 to vector<8x32xf32>
    %c0_2 = arith.constant 0 : index
    %c0_3 = arith.constant 0 : index
    %c0_4 = arith.constant 0 : index
    %c0_5 = arith.constant 0 : index
    %3 = vector.load %arg1[%c0_2, %c0_3, %c0_4, %c0_5] : memref<1x8x8x128xf32, #tpu.memory_space<vmem>>, vector<1x1x8x128xf32>
    %4 = vector.shape_cast %3 : vector<1x1x8x128xf32> to vector<8x128xf32>
    %cst_6 = arith.constant dense<0.000000e+00> : vector<8x128xf32>
    %5 = tpu.matmul %1, %0, %cst_6 {dimension_numbers = #tpu.dot_dimension_numbers<[1], [0], [0], [1], [0, 0, 1, 1], [], []>} : vector<8x32xf32>, vector<32x128xf32>, vector<8x128xf32> -> vector<8x128xf32>
    %6 = arith.addf %4, %5 : vector<8x128xf32>
    %7 = arith.negf %6 : vector<8x128xf32>
    %8 = math.exp %7 : vector<8x128xf32>
    %cst_7 = arith.constant 1.000000e+00 : f32
    %9 = vector.broadcast %cst_7 : f32 to vector<8x128xf32>
    %10 = arith.addf %9, %8 : vector<8x128xf32>
    %11 = arith.divf %9, %10 : vector<8x128xf32>
    %12 = vector.extract_strided_slice %11 {offsets = [0, 0], sizes = [8, 32], strides = [1, 1]} : vector<8x128xf32> to vector<8x32xf32>
    %13 = vector.extract_strided_slice %11 {offsets = [0, 32], sizes = [8, 32], strides = [1, 1]} : vector<8x128xf32> to vector<8x32xf32>
    %14 = vector.extract_strided_slice %11 {offsets = [0, 64], sizes = [8, 32], strides = [1, 1]} : vector<8x128xf32> to vector<8x32xf32>
    %cst_8 = arith.constant 2.000000e+00 : f32
    %15 = vector.broadcast %cst_8 : f32 to vector<8x32xf32>
    %16 = arith.mulf %15, %14 : vector<8x32xf32>
    %cst_9 = arith.constant 1.000000e+00 : f32
    %17 = vector.broadcast %cst_9 : f32 to vector<8x32xf32>
    %18 = arith.subf %16, %17 : vector<8x32xf32>
    %19 = vector.extract_strided_slice %11 {offsets = [0, 96], sizes = [8, 32], strides = [1, 1]} : vector<8x128xf32> to vector<8x32xf32>
    %20 = arith.mulf %13, %2 : vector<8x32xf32>
    %21 = arith.mulf %12, %18 : vector<8x32xf32>
    %22 = arith.addf %20, %21 : vector<8x32xf32>
    %23 = math.tanh %22 : vector<8x32xf32>
    %24 = arith.mulf %19, %23 : vector<8x32xf32>
    %c0_10 = arith.constant 0 : index
    %c1 = arith.constant 1 : index
    %c0_11 = arith.constant 0 : index
    %c0_12 = arith.constant 0 : index
    %25 = vector.load %arg1[%c0_10, %c1, %c0_11, %c0_12] : memref<1x8x8x128xf32, #tpu.memory_space<vmem>>, vector<1x1x8x128xf32>
    %26 = vector.shape_cast %25 : vector<1x1x8x128xf32> to vector<8x128xf32>
    %cst_13 = arith.constant dense<0.000000e+00> : vector<8x128xf32>
    %27 = tpu.matmul %24, %0, %cst_13 {dimension_numbers = #tpu.dot_dimension_numbers<[1], [0], [0], [1], [0, 0, 1, 1], [], []>} : vector<8x32xf32>, vector<32x128xf32>, vector<8x128xf32> -> vector<8x128xf32>
    %28 = arith.addf %26, %27 : vector<8x128xf32>
    %29 = arith.negf %28 : vector<8x128xf32>
    %30 = math.exp %29 : vector<8x128xf32>
    %cst_14 = arith.constant 1.000000e+00 : f32
    %31 = vector.broadcast %cst_14 : f32 to vector<8x128xf32>
    %32 = arith.addf %31, %30 : vector<8x128xf32>
    %33 = arith.divf %31, %32 : vector<8x128xf32>
    %34 = vector.extract_strided_slice %33 {offsets = [0, 0], sizes = [8, 32], strides = [1, 1]} : vector<8x128xf32> to vector<8x32xf32>
    %35 = vector.extract_strided_slice %33 {offsets = [0, 32], sizes = [8, 32], strides = [1, 1]} : vector<8x128xf32> to vector<8x32xf32>
    %36 = vector.extract_strided_slice %33 {offsets = [0, 64], sizes = [8, 32], strides = [1, 1]} : vector<8x128xf32> to vector<8x32xf32>
    %cst_15 = arith.constant 2.000000e+00 : f32
    %37 = vector.broadcast %cst_15 : f32 to vector<8x32xf32>
    %38 = arith.mulf %37, %36 : vector<8x32xf32>
    %cst_16 = arith.constant 1.000000e+00 : f32
    %39 = vector.broadcast %cst_16 : f32 to vector<8x32xf32>
    %40 = arith.subf %38, %39 : vector<8x32xf32>
    %41 = vector.extract_strided_slice %33 {offsets = [0, 96], sizes = [8, 32], strides = [1, 1]} : vector<8x128xf32> to vector<8x32xf32>
    %42 = arith.mulf %35, %22 : vector<8x32xf32>
    %43 = arith.mulf %34, %40 : vector<8x32xf32>
    %44 = arith.addf %42, %43 : vector<8x32xf32>
    %45 = math.tanh %44 : vector<8x32xf32>
    %46 = arith.mulf %41, %45 : vector<8x32xf32>
    %c0_17 = arith.constant 0 : index
    %c2 = arith.constant 2 : index
    %c0_18 = arith.constant 0 : index
    %c0_19 = arith.constant 0 : index
    %47 = vector.load %arg1[%c0_17, %c2, %c0_18, %c0_19] : memref<1x8x8x128xf32, #tpu.memory_space<vmem>>, vector<1x1x8x128xf32>
    %48 = vector.shape_cast %47 : vector<1x1x8x128xf32> to vector<8x128xf32>
    %cst_20 = arith.constant dense<0.000000e+00> : vector<8x128xf32>
    %49 = tpu.matmul %46, %0, %cst_20 {dimension_numbers = #tpu.dot_dimension_numbers<[1], [0], [0], [1], [0, 0, 1, 1], [], []>} : vector<8x32xf32>, vector<32x128xf32>, vector<8x128xf32> -> vector<8x128xf32>
    %50 = arith.addf %48, %49 : vector<8x128xf32>
    %51 = arith.negf %50 : vector<8x128xf32>
    %52 = math.exp %51 : vector<8x128xf32>
    %cst_21 = arith.constant 1.000000e+00 : f32
    %53 = vector.broadcast %cst_21 : f32 to vector<8x128xf32>
    %54 = arith.addf %53, %52 : vector<8x128xf32>
    %55 = arith.divf %53, %54 : vector<8x128xf32>
    %56 = vector.extract_strided_slice %55 {offsets = [0, 0], sizes = [8, 32], strides = [1, 1]} : vector<8x128xf32> to vector<8x32xf32>
    %57 = vector.extract_strided_slice %55 {offsets = [0, 32], sizes = [8, 32], strides = [1, 1]} : vector<8x128xf32> to vector<8x32xf32>
    %58 = vector.extract_strided_slice %55 {offsets = [0, 64], sizes = [8, 32], strides = [1, 1]} : vector<8x128xf32> to vector<8x32xf32>
    %cst_22 = arith.constant 2.000000e+00 : f32
    %59 = vector.broadcast %cst_22 : f32 to vector<8x32xf32>
    %60 = arith.mulf %59, %58 : vector<8x32xf32>
    %cst_23 = arith.constant 1.000000e+00 : f32
    %61 = vector.broadcast %cst_23 : f32 to vector<8x32xf32>
    %62 = arith.subf %60, %61 : vector<8x32xf32>
    %63 = vector.extract_strided_slice %55 {offsets = [0, 96], sizes = [8, 32], strides = [1, 1]} : vector<8x128xf32> to vector<8x32xf32>
    %64 = arith.mulf %57, %44 : vector<8x32xf32>
    %65 = arith.mulf %56, %62 : vector<8x32xf32>
    %66 = arith.addf %64, %65 : vector<8x32xf32>
    %67 = math.tanh %66 : vector<8x32xf32>
    %68 = arith.mulf %63, %67 : vector<8x32xf32>
    %c0_24 = arith.constant 0 : index
    %c3 = arith.constant 3 : index
    %c0_25 = arith.constant 0 : index
    %c0_26 = arith.constant 0 : index
    %69 = vector.load %arg1[%c0_24, %c3, %c0_25, %c0_26] : memref<1x8x8x128xf32, #tpu.memory_space<vmem>>, vector<1x1x8x128xf32>
    %70 = vector.shape_cast %69 : vector<1x1x8x128xf32> to vector<8x128xf32>
    %cst_27 = arith.constant dense<0.000000e+00> : vector<8x128xf32>
    %71 = tpu.matmul %68, %0, %cst_27 {dimension_numbers = #tpu.dot_dimension_numbers<[1], [0], [0], [1], [0, 0, 1, 1], [], []>} : vector<8x32xf32>, vector<32x128xf32>, vector<8x128xf32> -> vector<8x128xf32>
    %72 = arith.addf %70, %71 : vector<8x128xf32>
    %73 = arith.negf %72 : vector<8x128xf32>
    %74 = math.exp %73 : vector<8x128xf32>
    %cst_28 = arith.constant 1.000000e+00 : f32
    %75 = vector.broadcast %cst_28 : f32 to vector<8x128xf32>
    %76 = arith.addf %75, %74 : vector<8x128xf32>
    %77 = arith.divf %75, %76 : vector<8x128xf32>
    %78 = vector.extract_strided_slice %77 {offsets = [0, 0], sizes = [8, 32], strides = [1, 1]} : vector<8x128xf32> to vector<8x32xf32>
    %79 = vector.extract_strided_slice %77 {offsets = [0, 32], sizes = [8, 32], strides = [1, 1]} : vector<8x128xf32> to vector<8x32xf32>
    %80 = vector.extract_strided_slice %77 {offsets = [0, 64], sizes = [8, 32], strides = [1, 1]} : vector<8x128xf32> to vector<8x32xf32>
    %cst_29 = arith.constant 2.000000e+00 : f32
    %81 = vector.broadcast %cst_29 : f32 to vector<8x32xf32>
    %82 = arith.mulf %81, %80 : vector<8x32xf32>
    %cst_30 = arith.constant 1.000000e+00 : f32
    %83 = vector.broadcast %cst_30 : f32 to vector<8x32xf32>
    %84 = arith.subf %82, %83 : vector<8x32xf32>
    %85 = vector.extract_strided_slice %77 {offsets = [0, 96], sizes = [8, 32], strides = [1, 1]} : vector<8x128xf32> to vector<8x32xf32>
    %86 = arith.mulf %79, %66 : vector<8x32xf32>
    %87 = arith.mulf %78, %84 : vector<8x32xf32>
    %88 = arith.addf %86, %87 : vector<8x32xf32>
    %89 = math.tanh %88 : vector<8x32xf32>
    %90 = arith.mulf %85, %89 : vector<8x32xf32>
    %c0_31 = arith.constant 0 : index
    %c4 = arith.constant 4 : index
    %c0_32 = arith.constant 0 : index
    %c0_33 = arith.constant 0 : index
    %91 = vector.load %arg1[%c0_31, %c4, %c0_32, %c0_33] : memref<1x8x8x128xf32, #tpu.memory_space<vmem>>, vector<1x1x8x128xf32>
    %92 = vector.shape_cast %91 : vector<1x1x8x128xf32> to vector<8x128xf32>
    %cst_34 = arith.constant dense<0.000000e+00> : vector<8x128xf32>
    %93 = tpu.matmul %90, %0, %cst_34 {dimension_numbers = #tpu.dot_dimension_numbers<[1], [0], [0], [1], [0, 0, 1, 1], [], []>} : vector<8x32xf32>, vector<32x128xf32>, vector<8x128xf32> -> vector<8x128xf32>
    %94 = arith.addf %92, %93 : vector<8x128xf32>
    %95 = arith.negf %94 : vector<8x128xf32>
    %96 = math.exp %95 : vector<8x128xf32>
    %cst_35 = arith.constant 1.000000e+00 : f32
    %97 = vector.broadcast %cst_35 : f32 to vector<8x128xf32>
    %98 = arith.addf %97, %96 : vector<8x128xf32>
    %99 = arith.divf %97, %98 : vector<8x128xf32>
    %100 = vector.extract_strided_slice %99 {offsets = [0, 0], sizes = [8, 32], strides = [1, 1]} : vector<8x128xf32> to vector<8x32xf32>
    %101 = vector.extract_strided_slice %99 {offsets = [0, 32], sizes = [8, 32], strides = [1, 1]} : vector<8x128xf32> to vector<8x32xf32>
    %102 = vector.extract_strided_slice %99 {offsets = [0, 64], sizes = [8, 32], strides = [1, 1]} : vector<8x128xf32> to vector<8x32xf32>
    %cst_36 = arith.constant 2.000000e+00 : f32
    %103 = vector.broadcast %cst_36 : f32 to vector<8x32xf32>
    %104 = arith.mulf %103, %102 : vector<8x32xf32>
    %cst_37 = arith.constant 1.000000e+00 : f32
    %105 = vector.broadcast %cst_37 : f32 to vector<8x32xf32>
    %106 = arith.subf %104, %105 : vector<8x32xf32>
    %107 = vector.extract_strided_slice %99 {offsets = [0, 96], sizes = [8, 32], strides = [1, 1]} : vector<8x128xf32> to vector<8x32xf32>
    %108 = arith.mulf %101, %88 : vector<8x32xf32>
    %109 = arith.mulf %100, %106 : vector<8x32xf32>
    %110 = arith.addf %108, %109 : vector<8x32xf32>
    %111 = math.tanh %110 : vector<8x32xf32>
    %112 = arith.mulf %107, %111 : vector<8x32xf32>
    %c0_38 = arith.constant 0 : index
    %c5 = arith.constant 5 : index
    %c0_39 = arith.constant 0 : index
    %c0_40 = arith.constant 0 : index
    %113 = vector.load %arg1[%c0_38, %c5, %c0_39, %c0_40] : memref<1x8x8x128xf32, #tpu.memory_space<vmem>>, vector<1x1x8x128xf32>
    %114 = vector.shape_cast %113 : vector<1x1x8x128xf32> to vector<8x128xf32>
    %cst_41 = arith.constant dense<0.000000e+00> : vector<8x128xf32>
    %115 = tpu.matmul %112, %0, %cst_41 {dimension_numbers = #tpu.dot_dimension_numbers<[1], [0], [0], [1], [0, 0, 1, 1], [], []>} : vector<8x32xf32>, vector<32x128xf32>, vector<8x128xf32> -> vector<8x128xf32>
    %116 = arith.addf %114, %115 : vector<8x128xf32>
    %117 = arith.negf %116 : vector<8x128xf32>
    %118 = math.exp %117 : vector<8x128xf32>
    %cst_42 = arith.constant 1.000000e+00 : f32
    %119 = vector.broadcast %cst_42 : f32 to vector<8x128xf32>
    %120 = arith.addf %119, %118 : vector<8x128xf32>
    %121 = arith.divf %119, %120 : vector<8x128xf32>
    %122 = vector.extract_strided_slice %121 {offsets = [0, 0], sizes = [8, 32], strides = [1, 1]} : vector<8x128xf32> to vector<8x32xf32>
    %123 = vector.extract_strided_slice %121 {offsets = [0, 32], sizes = [8, 32], strides = [1, 1]} : vector<8x128xf32> to vector<8x32xf32>
    %124 = vector.extract_strided_slice %121 {offsets = [0, 64], sizes = [8, 32], strides = [1, 1]} : vector<8x128xf32> to vector<8x32xf32>
    %cst_43 = arith.constant 2.000000e+00 : f32
    %125 = vector.broadcast %cst_43 : f32 to vector<8x32xf32>
    %126 = arith.mulf %125, %124 : vector<8x32xf32>
    %cst_44 = arith.constant 1.000000e+00 : f32
    %127 = vector.broadcast %cst_44 : f32 to vector<8x32xf32>
    %128 = arith.subf %126, %127 : vector<8x32xf32>
    %129 = vector.extract_strided_slice %121 {offsets = [0, 96], sizes = [8, 32], strides = [1, 1]} : vector<8x128xf32> to vector<8x32xf32>
    %130 = arith.mulf %123, %110 : vector<8x32xf32>
    %131 = arith.mulf %122, %128 : vector<8x32xf32>
    %132 = arith.addf %130, %131 : vector<8x32xf32>
    %133 = math.tanh %132 : vector<8x32xf32>
    %134 = arith.mulf %129, %133 : vector<8x32xf32>
    %c0_45 = arith.constant 0 : index
    %c6 = arith.constant 6 : index
    %c0_46 = arith.constant 0 : index
    %c0_47 = arith.constant 0 : index
    %135 = vector.load %arg1[%c0_45, %c6, %c0_46, %c0_47] : memref<1x8x8x128xf32, #tpu.memory_space<vmem>>, vector<1x1x8x128xf32>
    %136 = vector.shape_cast %135 : vector<1x1x8x128xf32> to vector<8x128xf32>
    %cst_48 = arith.constant dense<0.000000e+00> : vector<8x128xf32>
    %137 = tpu.matmul %134, %0, %cst_48 {dimension_numbers = #tpu.dot_dimension_numbers<[1], [0], [0], [1], [0, 0, 1, 1], [], []>} : vector<8x32xf32>, vector<32x128xf32>, vector<8x128xf32> -> vector<8x128xf32>
    %138 = arith.addf %136, %137 : vector<8x128xf32>
    %139 = arith.negf %138 : vector<8x128xf32>
    %140 = math.exp %139 : vector<8x128xf32>
    %cst_49 = arith.constant 1.000000e+00 : f32
    %141 = vector.broadcast %cst_49 : f32 to vector<8x128xf32>
    %142 = arith.addf %141, %140 : vector<8x128xf32>
    %143 = arith.divf %141, %142 : vector<8x128xf32>
    %144 = vector.extract_strided_slice %143 {offsets = [0, 0], sizes = [8, 32], strides = [1, 1]} : vector<8x128xf32> to vector<8x32xf32>
    %145 = vector.extract_strided_slice %143 {offsets = [0, 32], sizes = [8, 32], strides = [1, 1]} : vector<8x128xf32> to vector<8x32xf32>
    %146 = vector.extract_strided_slice %143 {offsets = [0, 64], sizes = [8, 32], strides = [1, 1]} : vector<8x128xf32> to vector<8x32xf32>
    %cst_50 = arith.constant 2.000000e+00 : f32
    %147 = vector.broadcast %cst_50 : f32 to vector<8x32xf32>
    %148 = arith.mulf %147, %146 : vector<8x32xf32>
    %cst_51 = arith.constant 1.000000e+00 : f32
    %149 = vector.broadcast %cst_51 : f32 to vector<8x32xf32>
    %150 = arith.subf %148, %149 : vector<8x32xf32>
    %151 = vector.extract_strided_slice %143 {offsets = [0, 96], sizes = [8, 32], strides = [1, 1]} : vector<8x128xf32> to vector<8x32xf32>
    %152 = arith.mulf %145, %132 : vector<8x32xf32>
    %153 = arith.mulf %144, %150 : vector<8x32xf32>
    %154 = arith.addf %152, %153 : vector<8x32xf32>
    %155 = math.tanh %154 : vector<8x32xf32>
    %156 = arith.mulf %151, %155 : vector<8x32xf32>
    %c0_52 = arith.constant 0 : index
    %c7 = arith.constant 7 : index
    %c0_53 = arith.constant 0 : index
    %c0_54 = arith.constant 0 : index
    %157 = vector.load %arg1[%c0_52, %c7, %c0_53, %c0_54] : memref<1x8x8x128xf32, #tpu.memory_space<vmem>>, vector<1x1x8x128xf32>
    %158 = vector.shape_cast %157 : vector<1x1x8x128xf32> to vector<8x128xf32>
    %cst_55 = arith.constant dense<0.000000e+00> : vector<8x128xf32>
    %159 = tpu.matmul %156, %0, %cst_55 {dimension_numbers = #tpu.dot_dimension_numbers<[1], [0], [0], [1], [0, 0, 1, 1], [], []>} : vector<8x32xf32>, vector<32x128xf32>, vector<8x128xf32> -> vector<8x128xf32>
    %160 = arith.addf %158, %159 : vector<8x128xf32>
    %161 = arith.negf %160 : vector<8x128xf32>
    %162 = math.exp %161 : vector<8x128xf32>
    %cst_56 = arith.constant 1.000000e+00 : f32
    %163 = vector.broadcast %cst_56 : f32 to vector<8x128xf32>
    %164 = arith.addf %163, %162 : vector<8x128xf32>
    %165 = arith.divf %163, %164 : vector<8x128xf32>
    %166 = vector.extract_strided_slice %165 {offsets = [0, 0], sizes = [8, 32], strides = [1, 1]} : vector<8x128xf32> to vector<8x32xf32>
    %167 = vector.extract_strided_slice %165 {offsets = [0, 32], sizes = [8, 32], strides = [1, 1]} : vector<8x128xf32> to vector<8x32xf32>
    %168 = vector.extract_strided_slice %165 {offsets = [0, 64], sizes = [8, 32], strides = [1, 1]} : vector<8x128xf32> to vector<8x32xf32>
    %cst_57 = arith.constant 2.000000e+00 : f32
    %169 = vector.broadcast %cst_57 : f32 to vector<8x32xf32>
    %170 = arith.mulf %169, %168 : vector<8x32xf32>
    %cst_58 = arith.constant 1.000000e+00 : f32
    %171 = vector.broadcast %cst_58 : f32 to vector<8x32xf32>
    %172 = arith.subf %170, %171 : vector<8x32xf32>
    %173 = vector.extract_strided_slice %165 {offsets = [0, 96], sizes = [8, 32], strides = [1, 1]} : vector<8x128xf32> to vector<8x32xf32>
    %174 = arith.mulf %167, %154 : vector<8x32xf32>
    %175 = arith.mulf %166, %172 : vector<8x32xf32>
    %176 = arith.addf %174, %175 : vector<8x32xf32>
    %177 = math.tanh %176 : vector<8x32xf32>
    %178 = arith.mulf %173, %177 : vector<8x32xf32>
    %c0_59 = arith.constant 0 : index
    %c0_60 = arith.constant 0 : index
    %179 = vector.load %arg3[%c0_59, %c0_60] : memref<1x32xf32, #tpu.memory_space<vmem>>, vector<1x32xf32>
    %180 = vector.broadcast %179 : vector<1x32xf32> to vector<8x32xf32>
    %181 = arith.mulf %178, %180 : vector<8x32xf32>
    %cst_61 = arith.constant dense<0.000000e+00> : vector<8xf32>
    %182 = vector.multi_reduction <add>, %181, %cst_61 [1] : vector<8x32xf32> to vector<8xf32>
    %183 = vector.shape_cast %182 : vector<8xf32> to vector<8x1xf32>
    %c0_62 = arith.constant 0 : index
    %c0_63 = arith.constant 0 : index
    %184 = vector.load %arg4[%c0_62, %c0_63] : memref<1x1xf32, #tpu.memory_space<vmem>>, vector<1x1xf32>
    %185 = vector.broadcast %184 : vector<1x1xf32> to vector<8x1xf32>
    %186 = arith.addf %183, %185 : vector<8x1xf32>
    %c0_64 = arith.constant 0 : index
    %c0_65 = arith.constant 0 : index
    %187 = vector.load %arg5[%c0_64, %c0_65] : memref<8x1xf32, #tpu.memory_space<vmem>>, vector<8x1xf32>
    tpu.vector_store %arg5[%c0_64, %c0_65], %186 {strides = array<i32>} : memref<8x1xf32, #tpu.memory_space<vmem>>, vector<8x1xf32>,
    return
  }
  func.func @transform_0(%arg0: i32) -> (i32, i32, i32, i32) {
    %c0_i32 = arith.constant 0 : i32
    %c0_i32_0 = arith.constant 0 : i32
    %c0_i32_1 = arith.constant 0 : i32
    %c0_i32_2 = arith.constant 0 : i32
    return %arg0, %c0_i32, %c0_i32_0, %c0_i32_1 : i32, i32, i32, i32
  }
  func.func @transform_1(%arg0: i32) -> (i32, i32) {
    %c0_i32 = arith.constant 0 : i32
    %c0_i32_0 = arith.constant 0 : i32
    %c0_i32_1 = arith.constant 0 : i32
    return %c0_i32, %c0_i32_0 : i32, i32
  }
  func.func @transform_2(%arg0: i32) -> (i32, i32) {
    %c0_i32 = arith.constant 0 : i32
    %c0_i32_0 = arith.constant 0 : i32
    %c0_i32_1 = arith.constant 0 : i32
    return %c0_i32, %c0_i32_0 : i32, i32
  }
  func.func @transform_3(%arg0: i32) -> (i32, i32) {
    %c0_i32 = arith.constant 0 : i32
    %c0_i32_0 = arith.constant 0 : i32
    %c0_i32_1 = arith.constant 0 : i32
    return %c0_i32, %c0_i32_0 : i32, i32
  }
  func.func @transform_4(%arg0: i32) -> (i32, i32) {
    %c0_i32 = arith.constant 0 : i32
    %c0_i32_0 = arith.constant 0 : i32
    return %arg0, %c0_i32 : i32, i32
  }
}

</mosaic_0001>

<bundles_post_ra>
// kernel: shallow_regression_lstm.1
= control target key start
LH: loop header
LB: loop body
LE: loop exit
PB: predicated region body
PF: predicated region fallthrough
CT: control target
= control target key end

     0   :  { %v1089_v0 = vmov 0.0   ;;  %vm1090_vm0 = vmmov 0   ;;  %s1091_s24 = smov 64   ;;  %s1092_s25 = smov 32   ;;  %vm24_vm1 = vcmask 261120   ;;  %vm870_vm2 = vcmask 7168   ;;  %s1293_s1 = inlined_call_operand.vmem [shape: f32[32,128], index: 1, kind: input, shape index: {}]   ;;  %s1294_s0 = inlined_call_operand.vmem [shape: f32[1,8,8,128], index: 0, kind: input, shape index: {}]   ;;  %s1295_s2 = inlined_call_operand.vmem [shape: f32[1,32], index: 2, kind: input, shape index: {}]   ;;  %s1296_s3 = inlined_call_operand.<no memory space> [shape: f32[1,1], index: 3, kind: input, shape index: {}]   ;;  %s1297_s4 = inlined_call_operand.vmem [shape: f32[8,1], index: 4, kind: output, shape index: {}]  }
   0x1   :  { %948 = vmatprep.subr.mxu0 %v1089_v0  ;;  %v1123_v1 = vld [vmem:[%s1293_s1 + $0x18] sm:$0xff]  ;;  %v1128_v2 = vld [vmem:[%s1293_s1 + $0x10] sm:$0xff]  ;;  %956 = vmatprep.mubr.msk.f32.mxu0 %vm1090_vm0, %v1089_v0  ;;  %v1138_v3 = vld [vmem:[%s1293_s1 + $0x8] sm:$0xff] }
   0x2   :  { %949 = vmatpush3.msra.mxu0 %v1123_v1  ;;  %959 = vmatprep.subr.mxu1 %v1089_v0  ;;  %v1147_v4 = vld [vmem:[%s1293_s1] sm:$0xff]  ;;  %v878_v24 = vld [vmem:[%s1294_s0 + $0x8] sm:$0xff]  ;;  %v882_v43 = vld [vmem:[%s1294_s0 + $0x10] sm:$0xff] }
   0x3   :  { %950 = vmatprep.subr.mxu0 %v1089_v0  ;;  %960 = vmatpush3.msra.mxu1 %v1123_v1  ;;  %v23_v5 = vld [vmem:[%s1294_s0] sm:$0xff]  ;;  %v886_v62 = vld [vmem:[%s1294_s0 + $0x18] sm:$0xff] }
   0x4   :  { %951 = vmatpush3.msra.mxu0 %v1128_v2  ;;  %961 = vmatprep.subr.mxu1 %v1089_v0 }
   0x5   :  { %952 = vmatprep.subr.mxu0 %v1089_v0  ;;  %962 = vmatpush3.msra.mxu1 %v1128_v2 }
   0x6   :  { %953 = vmatpush3.msra.mxu0 %v1138_v3  ;;  %963 = vmatprep.subr.mxu1 %v1089_v0 }
   0x7   :  { %954 = vmatprep.subr.mxu0 %v1089_v0  ;;  %964 = vmatpush3.msra.mxu1 %v1138_v3 }
   0x8   :  { %955 = vmatpush3.msra.mxu0 %v1147_v4  ;;  %965 = vmatprep.subr.mxu1 %v1089_v0 }
   0x9   :  { %957 = vmatmul.mubr.f32.vlgmr.msra.gmra.mxu0 %v1089_v0  ;;  %966 = vmatpush3.msra.mxu1 %v1147_v4 }
   0xa   :  { %967 = vmatprep.mubr.msk.f32.mxu1 %vm1090_vm0, %v1089_v0  ;;  %970 = vmatprep.subr.mxu0 %v1089_v0 }
   0xb   :  { %971 = vmatpush3.msra.mxu0 %v1123_v1  ;;  %978 = vmatprep.mubr.msk.f32.mxu0 %vm1090_vm0, %v1089_v0 }
   0xc   :  { %972 = vmatprep.subr.mxu0 %v1089_v0  ;;  %981 = vmatprep.subr.mxu1 %v1089_v0 }
   0xd   :  { %973 = vmatpush3.msra.mxu0 %v1128_v2 }
   0xe   :  { %974 = vmatprep.subr.mxu0 %v1089_v0 }
   0xf   :  { %975 = vmatpush3.msra.mxu0 %v1138_v3 }
  0x10   :  { %976 = vmatprep.subr.mxu0 %v1089_v0 }
  0x11   :  { %977 = vmatpush3.msra.mxu0 %v1147_v4 }
  0x12   :  { %992 = vmatprep.subr.mxu0 %v1089_v0 }
  0xc9   :  { %v94_v6 = vpop.f32.mrf.mxu0 }
  0xca   :  { %v98_v7 = vadd.f32 %v94_v6, %v23_v5 }
  0xcb   :  { %v958_v8 = vpop.f32.mrf.mxu0 }
  0xcc   :  { %v876_v9 = vmul.f32 -1.442695, %v98_v7 }
  0xce   :  { %1041 = vpow2.f32 %v876_v9 }
  0xdb   :  { %v1042_v10 = vpop.eup %1041 }
  0xdc   :  { %v102_v11 = vadd.f32 1.0, %v1042_v10 }
  0xde   :  { %1043 = vrcp.f32 %v102_v11 }
  0xeb   :  { %v1044_v12 = vpop.eup %1043 }
  0xec   :  { %v105_v13 = vmul.f32 2.0, %v1044_v12  ;;  %v107_v17 = vmul.f32 0.0, %v1044_v12 }
  0xee   :  { %v877_v14 = vadd.f32 -1.0, %v105_v13 }
  0xf0   :  { %109 = vrot.lane.b32.xlu0 %v877_v14, %s1091_s24 }
 0x162   :  { %v110_v15 = vpop.permute.xlu0 %109 }
 0x163   :  { %v112_v16 = vmul.f32 %v1044_v12, %v110_v15 }
 0x165   :  { %114 = vrot.lane.b32.xlu0 %v112_v16, %s1092_s25 }
 0x1d7   :  { %v115_v18 = vpop.permute.xlu0 %114 }
 0x1d8   :  { %v117_v19 = vadd.f32 %v115_v18, %v107_v17 }
 0x1da   :  { %1045 = vtanh.f32 %v117_v19 }
 0x1e7   :  { %v1046_v20 = vpop.eup %1045 }
 0x1e8   :  { %120 = vrot.lane.b32.xlu1 %v1046_v20, %s1091_s24 }
 0x25a   :  { %v121_v21 = vpop.permute.xlu1 %120 }
 0x25b   :  { %v123_v22 = vmul.f32 %v1044_v12, %v121_v21 }
 0x25d   :  { %127 = vrot.lane.b32.xlu1 %v123_v22, %s1092_s25  ;;  %v890_v22 = vld [vmem:[%s1294_s0 + $0x20] sm:$0xff] }
 0x2cf   :  { %v128_v23 = vpop.permute.xlu1 %127 }
 0x2d0   :  { %968 = vmatmul.mubr.msk.f32.vlgmr.msra.gmra.mxu1 %vm24_vm1, %v128_v23 }
 0x2d1   :  { %982 = vmatpush3.msra.mxu1 %v1123_v1  ;;  %989 = vmatprep.mubr.msk.f32.mxu1 %vm1090_vm0, %v1089_v0 }
 0x2d2   :  { %983 = vmatprep.subr.mxu1 %v1089_v0 }
 0x2d3   :  { %984 = vmatpush3.msra.mxu1 %v1128_v2 }
 0x2d4   :  { %985 = vmatprep.subr.mxu1 %v1089_v0 }
 0x2d5   :  { %986 = vmatpush3.msra.mxu1 %v1138_v3 }
 0x2d6   :  { %987 = vmatprep.subr.mxu1 %v1089_v0 }
 0x2d7   :  { %988 = vmatpush3.msra.mxu1 %v1147_v4 }
 0x2d8   :  { %1003 = vmatprep.subr.mxu1 %v1089_v0 }
 0x390   :  { %v197_v25 = vpop.f32.mrf.mxu1 }
 0x391   :  { %v201_v26 = vadd.f32 %v878_v24, %v197_v25 }
 0x392   :  { %v969_v27 = vpop.f32.mrf.mxu1 }
 0x393   :  { %v880_v28 = vmul.f32 -1.442695, %v201_v26 }
 0x395   :  { %1047 = vpow2.f32 %v880_v28 }
 0x3a2   :  { %v1048_v29 = vpop.eup %1047 }
 0x3a3   :  { %v205_v30 = vadd.f32 1.0, %v1048_v29 }
 0x3a5   :  { %1049 = vrcp.f32 %v205_v30 }
 0x3b2   :  { %v1050_v31 = vpop.eup %1049 }
 0x3b3   :  { %v208_v32 = vmul.f32 2.0, %v1050_v31  ;;  %v210_v36 = vmul.f32 %v1050_v31, %v117_v19 }
 0x3b5   :  { %v881_v33 = vadd.f32 -1.0, %v208_v32 }
 0x3b7   :  { %212 = vrot.lane.b32.xlu0 %v881_v33, %s1091_s24 }
 0x429   :  { %v213_v34 = vpop.permute.xlu0 %212 }
 0x42a   :  { %v215_v35 = vmul.f32 %v1050_v31, %v213_v34 }
 0x42c   :  { %217 = vrot.lane.b32.xlu1 %v215_v35, %s1092_s25 }
 0x49e   :  { %v218_v37 = vpop.permute.xlu1 %217 }
 0x49f   :  { %v220_v38 = vadd.f32 %v218_v37, %v210_v36 }
 0x4a1   :  { %1051 = vtanh.f32 %v220_v38 }
 0x4ae   :  { %v1052_v39 = vpop.eup %1051 }
 0x4af   :  { %223 = vrot.lane.b32.xlu0 %v1052_v39, %s1091_s24 }
 0x521   :  { %v224_v40 = vpop.permute.xlu0 %223 }
 0x522   :  { %v226_v41 = vmul.f32 %v1050_v31, %v224_v40 }
 0x524   :  { %230 = vrot.lane.b32.xlu1 %v226_v41, %s1092_s25  ;;  %v894_v41 = vld [vmem:[%s1294_s0 + $0x28] sm:$0xff] }
 0x596   :  { %v231_v42 = vpop.permute.xlu1 %230 }
 0x597   :  { %979 = vmatmul.mubr.msk.f32.vlgmr.msra.gmra.mxu0 %vm24_vm1, %v231_v42 }
 0x598   :  { %993 = vmatpush3.msra.mxu0 %v1123_v1  ;;  %1000 = vmatprep.mubr.msk.f32.mxu0 %vm1090_vm0, %v1089_v0 }
 0x599   :  { %994 = vmatprep.subr.mxu0 %v1089_v0 }
 0x59a   :  { %995 = vmatpush3.msra.mxu0 %v1128_v2 }
 0x59b   :  { %996 = vmatprep.subr.mxu0 %v1089_v0 }
 0x59c   :  { %997 = vmatpush3.msra.mxu0 %v1138_v3 }
 0x59d   :  { %998 = vmatprep.subr.mxu0 %v1089_v0 }
 0x59e   :  { %999 = vmatpush3.msra.mxu0 %v1147_v4 }
 0x59f   :  { %1014 = vmatprep.subr.mxu0 %v1089_v0 }
 0x657   :  { %v300_v44 = vpop.f32.mrf.mxu0 }
 0x658   :  { %v304_v45 = vadd.f32 %v882_v43, %v300_v44 }
 0x659   :  { %v980_v46 = vpop.f32.mrf.mxu0 }
 0x65a   :  { %v884_v47 = vmul.f32 -1.442695, %v304_v45 }
 0x65c   :  { %1053 = vpow2.f32 %v884_v47 }
 0x669   :  { %v1054_v48 = vpop.eup %1053 }
 0x66a   :  { %v308_v49 = vadd.f32 1.0, %v1054_v48 }
 0x66c   :  { %1055 = vrcp.f32 %v308_v49 }
 0x679   :  { %v1056_v50 = vpop.eup %1055 }
 0x67a   :  { %v311_v51 = vmul.f32 2.0, %v1056_v50  ;;  %v313_v55 = vmul.f32 %v1056_v50, %v220_v38 }
 0x67c   :  { %v885_v52 = vadd.f32 -1.0, %v311_v51 }
 0x67e   :  { %315 = vrot.lane.b32.xlu0 %v885_v52, %s1091_s24 }
 0x6f0   :  { %v316_v53 = vpop.permute.xlu0 %315 }
 0x6f1   :  { %v318_v54 = vmul.f32 %v1056_v50, %v316_v53 }
 0x6f3   :  { %320 = vrot.lane.b32.xlu1 %v318_v54, %s1092_s25 }
 0x765   :  { %v321_v56 = vpop.permute.xlu1 %320 }
 0x766   :  { %v323_v57 = vadd.f32 %v321_v56, %v313_v55  ;;  %v898_v55 = vld [vmem:[%s1294_s0 + $0x30] sm:$0xff] }
 0x768   :  { %1057 = vtanh.f32 %v323_v57 }
 0x775   :  { %v1058_v58 = vpop.eup %1057 }
 0x776   :  { %326 = vrot.lane.b32.xlu0 %v1058_v58, %s1091_s24 }
 0x7e8   :  { %v327_v59 = vpop.permute.xlu0 %326 }
 0x7e9   :  { %v329_v60 = vmul.f32 %v1056_v50, %v327_v59 }
 0x7eb   :  { %333 = vrot.lane.b32.xlu1 %v329_v60, %s1092_s25 }
 0x85d   :  { %v334_v61 = vpop.permute.xlu1 %333 }
 0x85e   :  { %990 = vmatmul.mubr.msk.f32.vlgmr.msra.gmra.mxu1 %vm24_vm1, %v334_v61 }
 0x85f   :  { %1004 = vmatpush3.msra.mxu1 %v1123_v1  ;;  %1011 = vmatprep.mubr.msk.f32.mxu1 %vm1090_vm0, %v1089_v0 }
 0x860   :  { %1005 = vmatprep.subr.mxu1 %v1089_v0 }
 0x861   :  { %1006 = vmatpush3.msra.mxu1 %v1128_v2 }
 0x862   :  { %1007 = vmatprep.subr.mxu1 %v1089_v0 }
 0x863   :  { %1008 = vmatpush3.msra.mxu1 %v1138_v3 }
 0x864   :  { %1009 = vmatprep.subr.mxu1 %v1089_v0 }
 0x865   :  { %1010 = vmatpush3.msra.mxu1 %v1147_v4 }
 0x866   :  { %1025 = vmatprep.subr.mxu1 %v1089_v0 }
 0x91e   :  { %v403_v63 = vpop.f32.mrf.mxu1 }
 0x91f   :  { %v407_v5 = vadd.f32 %v886_v62, %v403_v63 }
 0x920   :  { %v991_v6 = vpop.f32.mrf.mxu1 }
 0x921   :  { %v888_v7 = vmul.f32 -1.442695, %v407_v5 }
 0x923   :  { %1059 = vpow2.f32 %v888_v7 }
 0x930   :  { %v1060_v8 = vpop.eup %1059 }
 0x931   :  { %v411_v9 = vadd.f32 1.0, %v1060_v8 }
 0x933   :  { %1061 = vrcp.f32 %v411_v9 }
 0x940   :  { %v1062_v10 = vpop.eup %1061 }
 0x941   :  { %v414_v11 = vmul.f32 2.0, %v1062_v10  ;;  %v416_v15 = vmul.f32 %v1062_v10, %v323_v57 }
 0x943   :  { %v889_v12 = vadd.f32 -1.0, %v414_v11 }
 0x945   :  { %418 = vrot.lane.b32.xlu0 %v889_v12, %s1091_s24 }
 0x9b7   :  { %v419_v13 = vpop.permute.xlu0 %418 }
 0x9b8   :  { %v421_v14 = vmul.f32 %v1062_v10, %v419_v13 }
 0x9ba   :  { %423 = vrot.lane.b32.xlu1 %v421_v14, %s1092_s25 }
 0xa2c   :  { %v424_v16 = vpop.permute.xlu1 %423 }
 0xa2d   :  { %v426_v17 = vadd.f32 %v424_v16, %v416_v15  ;;  %v902_v15 = vld [vmem:[%s1294_s0 + $0x38] sm:$0xff]  ;;  %s1093_s0 = smov 96  }
 0xa2f   :  { %1063 = vtanh.f32 %v426_v17 }
 0xa3c   :  { %v1064_v18 = vpop.eup %1063 }
 0xa3d   :  { %429 = vrot.lane.b32.xlu0 %v1064_v18, %s1091_s24 }
 0xaaf   :  { %v430_v19 = vpop.permute.xlu0 %429 }
 0xab0   :  { %v432_v20 = vmul.f32 %v1062_v10, %v430_v19 }
 0xab2   :  { %436 = vrot.lane.b32.xlu1 %v432_v20, %s1092_s25 }
 0xb24   :  { %v437_v21 = vpop.permute.xlu1 %436 }
 0xb25   :  { %1001 = vmatmul.mubr.msk.f32.vlgmr.msra.gmra.mxu0 %vm24_vm1, %v437_v21 }
 0xb26   :  { %1015 = vmatpush3.msra.mxu0 %v1123_v1  ;;  %1022 = vmatprep.mubr.msk.f32.mxu0 %vm1090_vm0, %v1089_v0 }
 0xb27   :  { %1016 = vmatprep.subr.mxu0 %v1089_v0 }
 0xb28   :  { %1017 = vmatpush3.msra.mxu0 %v1128_v2 }
 0xb29   :  { %1018 = vmatprep.subr.mxu0 %v1089_v0 }
 0xb2a   :  { %1019 = vmatpush3.msra.mxu0 %v1138_v3 }
 0xb2b   :  { %1020 = vmatprep.subr.mxu0 %v1089_v0 }
 0xb2c   :  { %1021 = vmatpush3.msra.mxu0 %v1147_v4 }
 0xbe5   :  { %v506_v23 = vpop.f32.mrf.mxu0 }
 0xbe6   :  { %v510_v24 = vadd.f32 %v890_v22, %v506_v23 }
 0xbe7   :  { %v1002_v25 = vpop.f32.mrf.mxu0 }
 0xbe8   :  { %v892_v26 = vmul.f32 -1.442695, %v510_v24 }
 0xbea   :  { %1065 = vpow2.f32 %v892_v26 }
 0xbf7   :  { %v1066_v27 = vpop.eup %1065 }
 0xbf8   :  { %v514_v28 = vadd.f32 1.0, %v1066_v27  ;;  %v906_v27 = vld [vmem:[%s1295_s2] ss:$0 sm:$0xff] }
 0xbfa   :  { %1067 = vrcp.f32 %v514_v28 }
 0xc07   :  { %v1068_v29 = vpop.eup %1067 }
 0xc08   :  { %v517_v30 = vmul.f32 2.0, %v1068_v29  ;;  %v519_v34 = vmul.f32 %v1068_v29, %v426_v17 }
 0xc0a   :  { %v893_v31 = vadd.f32 -1.0, %v517_v30 }
 0xc0c   :  { %521 = vrot.lane.b32.xlu0 %v893_v31, %s1091_s24 }
 0xc7e   :  { %v522_v32 = vpop.permute.xlu0 %521 }
 0xc7f   :  { %v524_v33 = vmul.f32 %v1068_v29, %v522_v32  ;;  %v9_v32 = vstv %s1296_s3 }
 0xc80   :  { %10 = vst [vmem:[#allocation2] sm:$0x1] %v9_v32 }
 0xc81   :  { %526 = vrot.lane.b32.xlu1 %v524_v33, %s1092_s25 }
 0xcf3   :  { %v527_v35 = vpop.permute.xlu1 %526 }
 0xcf4   :  { %v529_v36 = vadd.f32 %v527_v35, %v519_v34 }
 0xcf6   :  { %1069 = vtanh.f32 %v529_v36 }
 0xd03   :  { %v1070_v37 = vpop.eup %1069 }
 0xd04   :  { %532 = vrot.lane.b32.xlu0 %v1070_v37, %s1091_s24 }
 0xd76   :  { %v533_v38 = vpop.permute.xlu0 %532 }
 0xd77   :  { %v535_v39 = vmul.f32 %v1068_v29, %v533_v38 }
 0xd79   :  { %539 = vrot.lane.b32.xlu1 %v535_v39, %s1092_s25  ;;  %v907_v39 = vld [vmem:[#allocation2] ss:$0 sm:$0xff] }
 0xdeb   :  { %v540_v40 = vpop.permute.xlu1 %539 }
 0xdec   :  { %1012 = vmatmul.mubr.msk.f32.vlgmr.msra.gmra.mxu1 %vm24_vm1, %v540_v40 }
 0xded   :  { %1026 = vmatpush3.msra.mxu1 %v1123_v1  ;;  %1033 = vmatprep.mubr.msk.f32.mxu1 %vm1090_vm0, %v1089_v0 }
 0xdee   :  { %1027 = vmatprep.subr.mxu1 %v1089_v0 }
 0xdef   :  { %1028 = vmatpush3.msra.mxu1 %v1128_v2 }
 0xdf0   :  { %1029 = vmatprep.subr.mxu1 %v1089_v0 }
 0xdf1   :  { %1030 = vmatpush3.msra.mxu1 %v1138_v3 }
 0xdf2   :  { %1031 = vmatprep.subr.mxu1 %v1089_v0 }
 0xdf3   :  { %1032 = vmatpush3.msra.mxu1 %v1147_v4 }
 0xeac   :  { %v609_v1 = vpop.f32.mrf.mxu1 }
 0xead   :  { %v613_v42 = vadd.f32 %v894_v41, %v609_v1 }
 0xeae   :  { %v1013_v43 = vpop.f32.mrf.mxu1 }
 0xeaf   :  { %v896_v44 = vmul.f32 -1.442695, %v613_v42 }
 0xeb1   :  { %1071 = vpow2.f32 %v896_v44 }
 0xebe   :  { %v1072_v45 = vpop.eup %1071 }
 0xebf   :  { %v617_v46 = vadd.f32 1.0, %v1072_v45 }
 0xec1   :  { %1073 = vrcp.f32 %v617_v46 }
 0xece   :  { %v1074_v2 = vpop.eup %1073 }
 0xecf   :  { %v620_v47 = vmul.f32 2.0, %v1074_v2  ;;  %v622_v4 = vmul.f32 %v1074_v2, %v529_v36 }
 0xed1   :  { %v897_v48 = vadd.f32 -1.0, %v620_v47 }
 0xed3   :  { %624 = vrot.lane.b32.xlu0 %v897_v48, %s1091_s24 }
 0xf45   :  { %v625_v0 = vpop.permute.xlu0 %624 }
 0xf46   :  { %v627_v3 = vmul.f32 %v1074_v2, %v625_v0 }
 0xf48   :  { %629 = vrot.lane.b32.xlu1 %v627_v3, %s1092_s25 }
 0xfba   :  { %v630_v49 = vpop.permute.xlu1 %629 }
 0xfbb   :  { %v632_v50 = vadd.f32 %v630_v49, %v622_v4 }
 0xfbd   :  { %1075 = vtanh.f32 %v632_v50 }
 0xfca   :  { %v1076_v51 = vpop.eup %1075 }
 0xfcb   :  { %635 = vrot.lane.b32.xlu0 %v1076_v51, %s1091_s24 }
0x103d   :  { %v636_v52 = vpop.permute.xlu0 %635 }
0x103e   :  { %v638_v53 = vmul.f32 %v1074_v2, %v636_v52 }
0x1040   :  { %642 = vrot.lane.b32.xlu1 %v638_v53, %s1092_s25 }
0x10b2   :  { %v643_v54 = vpop.permute.xlu1 %642 }
0x10b3   :  { %1023 = vmatmul.mubr.msk.f32.vlgmr.msra.gmra.mxu0 %vm24_vm1, %v643_v54 }
0x1173   :  { %v712_v56 = vpop.f32.mrf.mxu0 }
0x1174   :  { %v716_v57 = vadd.f32 %v898_v55, %v712_v56 }
0x1175   :  { %v1024_v58 = vpop.f32.mrf.mxu0 }
0x1176   :  { %v900_v59 = vmul.f32 -1.442695, %v716_v57 }
0x1178   :  { %1077 = vpow2.f32 %v900_v59 }
0x1185   :  { %v1078_v60 = vpop.eup %1077 }
0x1186   :  { %v720_v61 = vadd.f32 1.0, %v1078_v60 }
0x1188   :  { %1079 = vrcp.f32 %v720_v61 }
0x1195   :  { %v1080_v62 = vpop.eup %1079 }
0x1196   :  { %v723_v63 = vmul.f32 2.0, %v1080_v62  ;;  %v725_v8 = vmul.f32 %v1080_v62, %v632_v50 }
0x1198   :  { %v901_v5 = vadd.f32 -1.0, %v723_v63 }
0x119a   :  { %727 = vrot.lane.b32.xlu0 %v901_v5, %s1091_s24 }
0x120c   :  { %v728_v6 = vpop.permute.xlu0 %727 }
0x120d   :  { %v730_v7 = vmul.f32 %v1080_v62, %v728_v6 }
0x120f   :  { %732 = vrot.lane.b32.xlu1 %v730_v7, %s1092_s25 }
0x1281   :  { %v733_v9 = vpop.permute.xlu1 %732 }
0x1282   :  { %v735_v10 = vadd.f32 %v733_v9, %v725_v8 }
0x1284   :  { %1081 = vtanh.f32 %v735_v10 }
0x1291   :  { %v1082_v11 = vpop.eup %1081 }
0x1292   :  { %738 = vrot.lane.b32.xlu0 %v1082_v11, %s1091_s24 }
0x1304   :  { %v739_v12 = vpop.permute.xlu0 %738 }
0x1305   :  { %v741_v13 = vmul.f32 %v1080_v62, %v739_v12 }
0x1307   :  { %745 = vrot.lane.b32.xlu1 %v741_v13, %s1092_s25 }
0x1379   :  { %v746_v14 = vpop.permute.xlu1 %745 }
0x137a   :  { %1034 = vmatmul.mubr.msk.f32.vlgmr.msra.gmra.mxu1 %vm24_vm1, %v746_v14 }
0x143a   :  { %v815_v16 = vpop.f32.mrf.mxu1 }
0x143b   :  { %v819_v17 = vadd.f32 %v902_v15, %v815_v16 }
0x143c   :  { %v1035_v18 = vpop.f32.mrf.mxu1 }
0x143d   :  { %v904_v19 = vmul.f32 -1.442695, %v819_v17 }
0x143f   :  { %1083 = vpow2.f32 %v904_v19 }
0x144c   :  { %v1084_v20 = vpop.eup %1083 }
0x144d   :  { %v823_v21 = vadd.f32 1.0, %v1084_v20 }
0x144f   :  { %1085 = vrcp.f32 %v823_v21 }
0x145c   :  { %v1086_v22 = vpop.eup %1085 }
0x145d   :  { %v826_v23 = vmul.f32 2.0, %v1086_v22  ;;  %v828_v28 = vmul.f32 %v1086_v22, %v735_v10 }
0x145f   :  { %v905_v24 = vadd.f32 -1.0, %v826_v23 }
0x1461   :  { %830 = vrot.lane.b32.xlu0 %v905_v24, %s1091_s24 }
0x14d3   :  { %v831_v25 = vpop.permute.xlu0 %830 }
0x14d4   :  { %v833_v26 = vmul.f32 %v1086_v22, %v831_v25 }
0x14d6   :  { %835 = vrot.lane.b32.xlu1 %v833_v26, %s1092_s25 }
0x14da   :  { %851 = vrot.lane.b32.xlu1 %v906_v27, %s1093_s0 }
0x1548   :  { %v836_v29 = vpop.permute.xlu1 %835 }
0x1549   :  { %v838_v30 = vadd.f32 %v836_v29, %v828_v28 }
0x154b   :  { %1087 = vtanh.f32 %v838_v30 }
0x154c   :  { %v852_v34 = vpop.permute.xlu1 %851 }
0x1558   :  { %v1088_v31 = vpop.eup %1087 }
0x1559   :  { %841 = vrot.lane.b32.xlu0 %v1088_v31, %s1091_s24 }
0x15cb   :  { %v842_v33 = vpop.permute.xlu0 %841 }
0x15cc   :  { %v844_v35 = vmul.f32 %v1086_v22, %v842_v33 }
0x15ce   :  { %v854_v36 = vmul.f32 %v852_v34, %v844_v35 }
0x15d0   :  { %856 = vrot.lane.b32.xlu0 %v854_v36, %s1092_s25 }
0x1642   :  { %v857_v37 = vpop.permute.xlu0 %856 }
0x1643   :  { %v859_v38 = vsel %vm24_vm1, %v857_v37, 0.0 }
0x1644   :  { %860 = vadd.xlane.f32.xlu1 %v859_v38 }
0x16cd   :  { %v861_v40 = vpop.xlane.xlu1 %860 }
0x16ce   :  { %v869_v41 = vadd.f32 %v907_v39, %v861_v40 }
0x16d0   :  { %871 = vst.msk [vmem:[%s1297_s4] sm:$0xff] %vm870_vm2, %v869_v41 }

</bundles_post_ra>
